<compile_context>
chip_gen: v7x
topology: tpu7x:2x2x1
jax: 0.10.0
libtpu: 0.0.40
codegen_flags: <defaults>
</compile_context>

<pallas_src>
import functools
import math
import numpy as np

import jax
import jax.numpy as jnp
from jax.experimental import pallas as pl
from jax.experimental.pallas import tpu as pltpu


def _round_up(x, m):
    return ((x + m - 1) // m) * m


@functools.lru_cache(maxsize=None)
def _vmem_limit():
    """Generation-aware scoped-VMEM limit (v7x has only 64 MiB physical)."""
    try:
        cap = int(pltpu.get_tpu_info().vmem_capacity_bytes)
    except Exception:
        cap = 128 * 1024 * 1024
    return max(32 * 1024 * 1024, min(cap * 5 // 8, 100 * 1024 * 1024))


# -----------------------------------------------------------------------------
# Shared predictor conv stack: L x (Conv1d(k=3,pad=1) -> ReLU -> LayerNorm).
# Matmul operands bf16 (f32 accumulation); ReLU / LayerNorm math stays f32.
# -----------------------------------------------------------------------------
def _conv_stack(h, cw_ref, cb_ref, lng_ref, lnb_ref, not_first, not_last,
                valid=None):
    """h: (R, D) f32.  cw_ref: (L,3,D,D) bf16.  cb/ln_*: (L,D) f32.
    not_first / not_last / valid: (R, 1) bool row masks.  Returns (R, D) f32."""
    L = cw_ref.shape[0]
    R = h.shape[0]
    for l in range(L):                         # static unrolled layer loop
        if valid is not None and l > 0:
            # rows outside the real sequence are zero padding at every conv
            # layer input (exactly PyTorch's Conv1d padding=1 semantics);
            # at l == 0 the wrapper already supplies zero rows there.
            h = jnp.where(valid, h, 0.0)
        # shifted taps via XLU rotate + edge masks (no concatenate copies)
        prev = jnp.where(not_first, pltpu.roll(h, shift=1, axis=0), 0.0
                         ).astype(jnp.bfloat16)               # x[t-1]
        nxt = jnp.where(not_last, pltpu.roll(h, shift=R - 1, axis=0), 0.0
                        ).astype(jnp.bfloat16)                # x[t+1]
        hb = h.astype(jnp.bfloat16)

        y = (jnp.dot(prev, cw_ref[l, 0], preferred_element_type=jnp.float32)
             + jnp.dot(hb,   cw_ref[l, 1], preferred_element_type=jnp.float32)
             + jnp.dot(nxt,  cw_ref[l, 2], preferred_element_type=jnp.float32))
        y = y + cb_ref[pl.ds(l, 1), :]                        # (1, D) broadcast
        y = jnp.maximum(y, 0.0)                               # ReLU

        # LayerNorm over channels (eps=1e-5); var = E[y^2]-mean^2, rsqrt -> EUP
        mean = jnp.mean(y, axis=-1, keepdims=True)
        var = jnp.mean(y * y, axis=-1, keepdims=True) - mean * mean
        y = (y - mean) * jax.lax.rsqrt(var + 1e-5)
        h = y * lng_ref[pl.ds(l, 1), :] + lnb_ref[pl.ds(l, 1), :]
        # dropout: eval-mode identity (see TODO at top)
    return h


# -----------------------------------------------------------------------------
# Duration predictor kernel: whole batch folded into the MXU M dimension.
# -----------------------------------------------------------------------------
def _duration_kernel(x_ref, pos_ref, cw_ref, cb_ref, lng_ref, lnb_ref,
                     lw_ref, lb_ref, o_ref, *, t_pad, t_valid):
    h = x_ref[...].astype(jnp.float32)                        # (rows, D)
    pos = pos_ref[...]                                        # (rows, 1) int32
    not_first = pos > 0
    not_last = pos < (t_pad - 1)
    valid = (pos < t_valid) if t_valid < t_pad else None
    h = _conv_stack(h, cw_ref, cb_ref, lng_ref, lnb_ref,
                    not_first, not_last, valid)
    o_ref[...] = (jnp.dot(h.astype(jnp.bfloat16), lw_ref[...],
                          preferred_element_type=jnp.float32)
                  + lb_ref[...]).astype(o_ref.dtype)


def duration_predictor_forward(x, params):
    """x: (B, T, D) f32 -> (B, T) duration logits."""
    B, T, D = x.shape
    T_pad = _round_up(T, 8)
    if T_pad != T:
        x = jnp.pad(x, ((0, 0), (0, T_pad - T), (0, 0)))
    L = params["conv_w"].shape[0]
    NC = params["lin_w"].shape[1]                 # lane-dense padded head (128)

    # fold several whole sequences into one MXU M block; sequence boundaries
    # stay tile-aligned so the per-row position masks remain valid.
    b_step = min(B, max(1, 1024 // T_pad))
    while B % b_step:
        b_step -= 1
    rows = b_step * T_pad
    grid = (B // b_step,)

    x_flat = x.reshape(B * T_pad, D)
    pos = jnp.tile(jnp.arange(T_pad, dtype=jnp.int32), b_step).reshape(rows, 1)

    cost = pl.CostEstimate(
        flops=2 * B * T_pad * D * (3 * D * L + NC),
        transcendentals=B * T_pad * L,
        bytes_accessed=4 * B * T_pad * (D + NC)
        + 2 * int(params["conv_w"].size) + 2 * D * NC)

    out = pl.pallas_call(
        functools.partial(_duration_kernel, t_pad=T_pad, t_valid=T),
        out_shape=jax.ShapeDtypeStruct((B * T_pad, NC), jnp.float32),
        grid_spec=pltpu.PrefetchScalarGridSpec(
            num_scalar_prefetch=0,
            grid=grid,
            in_specs=[
                pl.BlockSpec((rows, D), lambda i: (i, 0)),
                pl.BlockSpec((rows, 1), lambda i: (0, 0)),
                pl.BlockSpec((L, 3, D, D), lambda i: (0, 0, 0, 0)),
                pl.BlockSpec((L, D), lambda i: (0, 0)),
                pl.BlockSpec((L, D), lambda i: (0, 0)),
                pl.BlockSpec((L, D), lambda i: (0, 0)),
                pl.BlockSpec((D, NC), lambda i: (0, 0)),
                pl.BlockSpec((1, NC), lambda i: (0, 0)),
            ],
            out_specs=pl.BlockSpec((rows, NC), lambda i: (i, 0)),
        ),
        compiler_params=pltpu.CompilerParams(
            dimension_semantics=("parallel",),
            vmem_limit_bytes=_vmem_limit()),
        cost_estimate=cost,
    )(x_flat, pos, params["conv_w"], params["conv_b"], params["ln_g"],
      params["ln_b"], params["lin_w"], params["lin_b"])
    return out[:, 0].reshape(B, T_pad)[:, :T]


# -----------------------------------------------------------------------------
# Fused pitch + energy predictors (+ residual add), mel-tiled with a conv halo.
# -----------------------------------------------------------------------------
def _pitch_energy_kernel(hs_ref, pemb_ref, eemb_ref,
                         pcw, pcb, plg, plb, plw, plbias,
                         ecw, ecb, elg, elb, elw, elbias,
                         p_ref, e_ref, hout_ref, *, halo, tile_t, tm_valid):
    h0 = hs_ref[0, 0].astype(jnp.float32)                 # (tile_t + 2*halo, D)
    R = h0.shape[0]
    local = jax.lax.broadcasted_iota(jnp.int32, (R, 1), 0)
    not_first = local > 0
    not_last = local < (R - 1)
    g = local + (pl.program_id(1) * tile_t - halo)        # global mel row index
    valid = (g >= 0) & (g < tm_valid)

    def branch(cw, cb, lg, lb, lw, lbias):
        h = _conv_stack(h0, cw, cb, lg, lb, not_first, not_last, valid)
        hc = h[halo:halo + tile_t]                        # central rows only
        return (jnp.dot(hc.astype(jnp.bfloat16), lw[...],
                        preferred_element_type=jnp.float32) + lbias[...])

    p_ref[0] = branch(pcw, pcb, plg, plb, plw, plbias).astype(p_ref.dtype)
    e_ref[0] = branch(ecw, ecb, elg, elb, elw, elbias).astype(e_ref.dtype)
    # fused residual add: hiddenSeq + pitchEmb + energyEmb (exact f32 rows)
    hout_ref[0] = (h0[halo:halo + tile_t]
                   + pemb_ref[0] + eemb_ref[0]).astype(hout_ref.dtype)


def pitch_energy_forward(hs_halo, pemb, eemb, pitch_params, energy_params, *,
                         tile_t, halo, tm_valid):
    """hs_halo: (B, n_t, tile_t + 2*halo, D); pemb/eemb: (B, n_t*tile_t, D)."""
    B, n_t, R, D = hs_halo.shape
    L = pitch_params["conv_w"].shape[0]
    tm_pad = n_t * tile_t

    def wspecs():
        return [
            pl.BlockSpec((L, 3, D, D), lambda b, t: (0, 0, 0, 0)),
            pl.BlockSpec((L, D), lambda b, t: (0, 0)),
            pl.BlockSpec((L, D), lambda b, t: (0, 0)),
            pl.BlockSpec((L, D), lambda b, t: (0, 0)),
            pl.BlockSpec((D, D), lambda b, t: (0, 0)),
            pl.BlockSpec((1, D), lambda b, t: (0, 0)),
        ]

    def wargs(p):
        return (p["conv_w"], p["conv_b"], p["ln_g"], p["ln_b"],
                p["lin_w"], p["lin_b"])

    tile_spec = pl.BlockSpec((1, tile_t, D), lambda b, t: (b, t, 0))
    out_shape = jax.ShapeDtypeStruct((B, tm_pad, D), jnp.float32)

    cost = pl.CostEstimate(
        flops=4 * B * n_t * D * D * (3 * L * R + tile_t),
        transcendentals=2 * B * n_t * R * L,
        bytes_accessed=4 * B * (n_t * R * D + 5 * tm_pad * D)
        + 4 * (3 * L + 1) * D * D)

    return pl.pallas_call(
        functools.partial(_pitch_energy_kernel, halo=halo, tile_t=tile_t,
                          tm_valid=tm_valid),
        out_shape=(out_shape, out_shape, out_shape),
        grid_spec=pltpu.PrefetchScalarGridSpec(
            num_scalar_prefetch=0,
            grid=(B, n_t),
            in_specs=[pl.BlockSpec((1, 1, R, D), lambda b, t: (b, t, 0, 0)),
                      tile_spec, tile_spec] + wspecs() + wspecs(),
            out_specs=(tile_spec, tile_spec, tile_spec),
        ),
        compiler_params=pltpu.CompilerParams(
            dimension_semantics=("parallel", "parallel"),
            vmem_limit_bytes=_vmem_limit()),
        cost_estimate=cost,
    )(hs_halo, pemb, eemb, *wargs(pitch_params), *wargs(energy_params))


# -----------------------------------------------------------------------------
# VarianceAdaptor forward (bGenerating=False path)
# -----------------------------------------------------------------------------
def variance_adaptor_forward(params, x, mf_align, pitch, energy,
                             alpha=1.0, pitch_alpha=1.0, energy_alpha=1.0,
                             tile_t_max=512):
    B, T, D = x.shape
    n_bins = params["pitch_table"].shape[0]
    L = params["pitch"]["conv_w"].shape[0]

    # ---- duration predictor (Pallas) ---------------------------------------
    d = duration_predictor_forward(x, params["duration"])
    if alpha != 1.0:
        d = jnp.round(alpha * d)

    # ---- length regulator (device-side; only max_len hits the host,
    #      mirroring PyTorch's .item()) --------------------------------------
    dur = jnp.maximum(mf_align.astype(jnp.int32), 0)
    csum = jnp.cumsum(dur, axis=1)                      # (B, T)
    hidden_len = csum[:, -1]
    max_len = max(int(jnp.max(hidden_len)), 1)          # host scalar sync

    halo = _round_up(L, 4)          # >= L rows of conv halo; keeps R % 8 == 0
    tile_t = min(tile_t_max, _round_up(max_len, 8))
    tm_pad = _round_up(max_len, tile_t)
    n_t = tm_pad // tile_t

    frames = jnp.arange(tm_pad, dtype=jnp.int32)
    gidx = jax.vmap(
        lambda c: jnp.searchsorted(c, frames, side="right"))(csum)
    gidx = gidx.astype(jnp.int32)                       # (B, tm_pad) in [0, T]

    # exact row gather; index T hits an appended zero row (padding frames)
    x1 = jnp.pad(x, ((0, 0), (0, 1), (0, 0)))
    hidden_seq = jnp.take_along_axis(x1, gidx[..., None], axis=1)  # (B,tm_pad,D)

    # ---- pitch / energy embeddings (exact nn.Embedding row lookups) --------
    def embed(v, a, table):
        idx = jnp.clip((a * v).astype(jnp.int32), 0, n_bins - 1)
        pad = tm_pad - idx.shape[1]
        idx = jnp.pad(idx, ((0, 0), (0, pad))) if pad > 0 else idx[:, :tm_pad]
        return table[idx]                               # (B, tm_pad, D)

    pitch_emb = embed(pitch, pitch_alpha, params["pitch_table"])
    energy_emb = embed(energy, energy_alpha, params["energy_table"])

    # ---- halo-expanded hidden sequence for the mel-tiled conv stacks -------
    hs_pad = jnp.pad(hidden_seq, ((0, 0), (halo, halo), (0, 0)))
    row_idx = (jnp.arange(n_t, dtype=jnp.int32)[:, None] * tile_t
               + jnp.arange(tile_t + 2 * halo, dtype=jnp.int32)[None, :])
    hs_halo = hs_pad[:, row_idx, :]                     # (B, n_t, tile+2H, D)

    p, e, hidden_out = pitch_energy_forward(
        hs_halo, pitch_emb, energy_emb, params["pitch"], params["energy"],
        tile_t=tile_t, halo=halo, tm_valid=max_len)

    s = slice(0, max_len)
    return (hidden_out[:, s], hidden_len, d, p[:, s], e[:, s],
            pitch_emb[:, s], energy_emb[:, s])


# -----------------------------------------------------------------------------
# Deterministic parameter construction + one-time preparation (hoisted casts)
# -----------------------------------------------------------------------------
def init_predictor_params(key, num_layers, d_dim, num_class):
    k0, k1 = jax.random.split(key)
    conv_scale = 1.0 / math.sqrt(3 * d_dim)
    lin_scale = 1.0 / math.sqrt(d_dim)
    return dict(
        conv_w=jax.random.normal(k0, (num_layers, 3, d_dim, d_dim),
                                 jnp.float32) * conv_scale,  # [l, k, c_in, c_out]
        conv_b=jnp.zeros((num_layers, d_dim), jnp.float32),
        ln_g=jnp.ones((num_layers, d_dim), jnp.float32),
        ln_b=jnp.zeros((num_layers, d_dim), jnp.float32),
        lin_w=jax.random.normal(k1, (d_dim, num_class), jnp.float32) * lin_scale,
        lin_b=jnp.zeros((1, num_class), jnp.float32),
    )


def init_variance_adaptor_params(key, n_dur, n_pitch, n_energy, d_dim):
    kd, kp, ke, kpt, ket = jax.random.split(key, 5)
    return dict(
        duration=init_predictor_params(kd, n_dur, d_dim, 1),
        pitch=init_predictor_params(kp, n_pitch, d_dim, d_dim),
        energy=init_predictor_params(ke, n_energy, d_dim, d_dim),
        pitch_table=jax.random.normal(kpt, (d_dim, d_dim), jnp.float32),
        energy_table=jax.random.normal(ket, (d_dim, d_dim), jnp.float32),
    )


def _prepare_predictor(p, pad_head_to=None):
    """Hoisted once: bf16 MXU operand casts + lane-dense head padding."""
    lin_w = p["lin_w"].astype(jnp.bfloat16)
    lin_b = p["lin_b"].astype(jnp.float32)
    if pad_head_to is not None and lin_w.shape[1] < pad_head_to:
        nc_in = lin_w.shape[1]
        lin_w = jnp.zeros((lin_w.shape[0], pad_head_to),
                          jnp.bfloat16).at[:, :nc_in].set(lin_w)
        lin_b = jnp.zeros((1, pad_head_to), jnp.float32).at[:, :nc_in].set(lin_b)
    return dict(conv_w=p["conv_w"].astype(jnp.bfloat16),
                conv_b=p["conv_b"], ln_g=p["ln_g"], ln_b=p["ln_b"],
                lin_w=lin_w, lin_b=lin_b)


def prepare_variance_adaptor_params(raw):
    return dict(
        duration=_prepare_predictor(raw["duration"], pad_head_to=128),
        pitch=_prepare_predictor(raw["pitch"]),
        energy=_prepare_predictor(raw["energy"]),
        pitch_table=raw["pitch_table"],
        energy_table=raw["energy_table"],
    )


# -----------------------------------------------------------------------------
if __name__ == "__main__":
    key = jax.random.PRNGKey(0)
    kparam, kx, kd, kp, ke = jax.random.split(key, 5)

    B, T, D = 2, 8, 128             # batch, phoneme length, hidden dDim
    n_layers = 2                    # per predictor

    raw = init_variance_adaptor_params(kparam, n_layers, n_layers, n_layers, D)
    params = prepare_variance_adaptor_params(raw)

    x = jax.random.normal(kx, (B, T, D), jnp.float32)
    mf_align = jax.random.randint(kd, (B, T), 1, 4, dtype=jnp.int32)  # dur 1..3

    max_len = int(jnp.max(jnp.sum(mf_align, axis=1)))
    pitch = jax.random.uniform(kp, (B, max_len), jnp.float32,
                               minval=0.0, maxval=float(D) - 1.0)
    energy = jax.random.uniform(ke, (B, max_len), jnp.float32,
                                minval=0.0, maxval=float(D) - 1.0)

    outs = variance_adaptor_forward(params, x, mf_align, pitch, energy)
    outs = jax.tree_util.tree_map(jax.block_until_ready, outs)

    hidden_out, hid_len, d, p, e, p_emb, e_emb = outs
    assert hidden_out.shape == (B, max_len, D)
    assert hid_len.shape == (B,)
    assert d.shape == (B, T)
    assert p.shape == (B, max_len, D) and e.shape == (B, max_len, D)
    assert p_emb.shape == (B, max_len, D) and e_emb.shape == (B, max_len, D)
    assert all(np.isfinite(np.asarray(o)).all() for o in
               (hidden_out, d, p, e, p_emb, e_emb))

    print("KERNEL_OK")
</pallas_src>

<mosaic_0001>
module attributes {stable_mosaic.version = 11 : i64} {
  func.func @_duration_kernel(%arg0: i32, %arg1: memref<16x128xf32, #tpu.memory_space<vmem>>, %arg2: memref<16x1xi32, #tpu.memory_space<vmem>>, %arg3: memref<2x3x128x128xbf16, #tpu.memory_space<vmem>>, %arg4: memref<2x128xf32, #tpu.memory_space<vmem>>, %arg5: memref<2x128xf32, #tpu.memory_space<vmem>>, %arg6: memref<2x128xf32, #tpu.memory_space<vmem>>, %arg7: memref<128x128xbf16, #tpu.memory_space<vmem>>, %arg8: memref<1x128xf32, #tpu.memory_space<vmem>>, %arg9: memref<16x128xf32, #tpu.memory_space<vmem>>) attributes {dimension_semantics = [#tpu.dimension_semantics<parallel>], iteration_bounds = array<i64: 1>, scalar_prefetch = 0 : i64, scratch_operands = 0 : i64, tpu.core_type = #tpu.core_type<tc>, window_params = [{transform_indices = @transform_0, window_bounds = array<i64: 16, 128>}, {pipeline_mode = #tpu.pipeline_mode<synchronous>, transform_indices = @transform_1, window_bounds = array<i64: 16, 1>}, {pipeline_mode = #tpu.pipeline_mode<synchronous>, transform_indices = @transform_2, window_bounds = array<i64: 2, 3, 128, 128>}, {pipeline_mode = #tpu.pipeline_mode<synchronous>, transform_indices = @transform_3, window_bounds = array<i64: 2, 128>}, {pipeline_mode = #tpu.pipeline_mode<synchronous>, transform_indices = @transform_4, window_bounds = array<i64: 2, 128>}, {pipeline_mode = #tpu.pipeline_mode<synchronous>, transform_indices = @transform_5, window_bounds = array<i64: 2, 128>}, {pipeline_mode = #tpu.pipeline_mode<synchronous>, transform_indices = @transform_6, window_bounds = array<i64: 128, 128>}, {pipeline_mode = #tpu.pipeline_mode<synchronous>, transform_indices = @transform_7, window_bounds = array<i64: 1, 128>}, {transform_indices = @transform_8, window_bounds = array<i64: 16, 128>}]} {
    %c0 = arith.constant 0 : index
    %c0_0 = arith.constant 0 : index
    %0 = vector.load %arg1[%c0, %c0_0] : memref<16x128xf32, #tpu.memory_space<vmem>>, vector<16x128xf32>
    %c0_1 = arith.constant 0 : index
    %c0_2 = arith.constant 0 : index
    %1 = vector.load %arg2[%c0_1, %c0_2] : memref<16x1xi32, #tpu.memory_space<vmem>>, vector<16x1xi32>
    %c0_i32 = arith.constant 0 : i32
    %2 = vector.broadcast %c0_i32 : i32 to vector<16x1xi32>
    %3 = arith.cmpi sgt, %1, %2 : vector<16x1xi32>
    %c7_i32 = arith.constant 7 : i32
    %4 = vector.broadcast %c7_i32 : i32 to vector<16x1xi32>
    %5 = arith.cmpi slt, %1, %4 : vector<16x1xi32>
    %c1_i32 = arith.constant 1 : i32
    %6 = tpu.dynamic_rotate %0 by %c1_i32 dim 0 : vector<16x128xf32>, i32 -> vector<16x128xf32>
    %cst = arith.constant 0.000000e+00 : f32
    %7 = vector.shape_cast %3 : vector<16x1xi1> to vector<16x1xi1>
    %8 = vector.broadcast %7 : vector<16x1xi1> to vector<16x128xi1>
    %9 = vector.broadcast %cst : f32 to vector<16x128xf32>
    %10 = arith.select %8, %6, %9 : vector<16x128xi1>, vector<16x128xf32>
    %11 = arith.truncf %10 : vector<16x128xf32> to vector<16x128xbf16>
    %c15_i32 = arith.constant 15 : i32
    %12 = tpu.dynamic_rotate %0 by %c15_i32 dim 0 : vector<16x128xf32>, i32 -> vector<16x128xf32>
    %cst_3 = arith.constant 0.000000e+00 : f32
    %13 = vector.shape_cast %5 : vector<16x1xi1> to vector<16x1xi1>
    %14 = vector.broadcast %13 : vector<16x1xi1> to vector<16x128xi1>
    %15 = vector.broadcast %cst_3 : f32 to vector<16x128xf32>
    %16 = arith.select %14, %12, %15 : vector<16x128xi1>, vector<16x128xf32>
    %17 = arith.truncf %16 : vector<16x128xf32> to vector<16x128xbf16>
    %18 = arith.truncf %0 : vector<16x128xf32> to vector<16x128xbf16>
    %c0_4 = arith.constant 0 : index
    %c0_5 = arith.constant 0 : index
    %c0_6 = arith.constant 0 : index
    %c0_7 = arith.constant 0 : index
    %19 = vector.load %arg3[%c0_4, %c0_5, %c0_6, %c0_7] : memref<2x3x128x128xbf16, #tpu.memory_space<vmem>>, vector<1x1x128x128xbf16>
    %20 = vector.shape_cast %19 : vector<1x1x128x128xbf16> to vector<128x128xbf16>
    %cst_8 = arith.constant dense<0.000000e+00> : vector<16x128xf32>
    %21 = tpu.matmul %11, %20, %cst_8 {dimension_numbers = #tpu.dot_dimension_numbers<[1], [0], [0], [1], [0, 0, 1, 1], [], []>} : vector<16x128xbf16>, vector<128x128xbf16>, vector<16x128xf32> -> vector<16x128xf32>
    %c0_9 = arith.constant 0 : index
    %c1 = arith.constant 1 : index
    %c0_10 = arith.constant 0 : index
    %c0_11 = arith.constant 0 : index
    %22 = vector.load %arg3[%c0_9, %c1, %c0_10, %c0_11] : memref<2x3x128x128xbf16, #tpu.memory_space<vmem>>, vector<1x1x128x128xbf16>
    %23 = vector.shape_cast %22 : vector<1x1x128x128xbf16> to vector<128x128xbf16>
    %cst_12 = arith.constant dense<0.000000e+00> : vector<16x128xf32>
    %24 = tpu.matmul %18, %23, %cst_12 {dimension_numbers = #tpu.dot_dimension_numbers<[1], [0], [0], [1], [0, 0, 1, 1], [], []>} : vector<16x128xbf16>, vector<128x128xbf16>, vector<16x128xf32> -> vector<16x128xf32>
    %25 = arith.addf %21, %24 : vector<16x128xf32>
    %c0_13 = arith.constant 0 : index
    %c2 = arith.constant 2 : index
    %c0_14 = arith.constant 0 : index
    %c0_15 = arith.constant 0 : index
    %26 = vector.load %arg3[%c0_13, %c2, %c0_14, %c0_15] : memref<2x3x128x128xbf16, #tpu.memory_space<vmem>>, vector<1x1x128x128xbf16>
    %27 = vector.shape_cast %26 : vector<1x1x128x128xbf16> to vector<128x128xbf16>
    %cst_16 = arith.constant dense<0.000000e+00> : vector<16x128xf32>
    %28 = tpu.matmul %17, %27, %cst_16 {dimension_numbers = #tpu.dot_dimension_numbers<[1], [0], [0], [1], [0, 0, 1, 1], [], []>} : vector<16x128xbf16>, vector<128x128xbf16>, vector<16x128xf32> -> vector<16x128xf32>
    %29 = arith.addf %25, %28 : vector<16x128xf32>
    %c0_17 = arith.constant 0 : index
    %c0_18 = arith.constant 0 : index
    %30 = vector.load %arg4[%c0_17, %c0_18] : memref<2x128xf32, #tpu.memory_space<vmem>>, vector<1x128xf32>
    %31 = vector.broadcast %30 : vector<1x128xf32> to vector<16x128xf32>
    %32 = arith.addf %29, %31 : vector<16x128xf32>
    %cst_19 = arith.constant 0.000000e+00 : f32
    %33 = vector.broadcast %cst_19 : f32 to vector<16x128xf32>
    %34 = arith.maximumf %32, %33 : vector<16x128xf32>
    %cst_20 = arith.constant dense<0.000000e+00> : vector<16xf32>
    %35 = vector.multi_reduction <add>, %34, %cst_20 [1] : vector<16x128xf32> to vector<16xf32>
    %36 = vector.shape_cast %35 : vector<16xf32> to vector<16x1xf32>
    %cst_21 = arith.constant 1.280000e+02 : f32
    %37 = vector.broadcast %cst_21 : f32 to vector<16x1xf32>
    %38 = arith.divf %36, %37 : vector<16x1xf32>
    %39 = arith.mulf %34, %34 : vector<16x128xf32>
    %cst_22 = arith.constant dense<0.000000e+00> : vector<16xf32>
    %40 = vector.multi_reduction <add>, %39, %cst_22 [1] : vector<16x128xf32> to vector<16xf32>
    %41 = vector.shape_cast %40 : vector<16xf32> to vector<16x1xf32>
    %cst_23 = arith.constant 1.280000e+02 : f32
    %42 = vector.broadcast %cst_23 : f32 to vector<16x1xf32>
    %43 = arith.divf %41, %42 : vector<16x1xf32>
    %44 = arith.mulf %38, %38 : vector<16x1xf32>
    %45 = arith.subf %43, %44 : vector<16x1xf32>
    %46 = vector.broadcast %38 : vector<16x1xf32> to vector<16x128xf32>
    %47 = arith.subf %34, %46 : vector<16x128xf32>
    %cst_24 = arith.constant 9.99999974E-6 : f32
    %48 = vector.broadcast %cst_24 : f32 to vector<16x1xf32>
    %49 = arith.addf %45, %48 : vector<16x1xf32>
    %50 = math.rsqrt %49 : vector<16x1xf32>
    %51 = vector.broadcast %50 : vector<16x1xf32> to vector<16x128xf32>
    %52 = arith.mulf %47, %51 : vector<16x128xf32>
    %c0_25 = arith.constant 0 : index
    %c0_26 = arith.constant 0 : index
    %53 = vector.load %arg5[%c0_25, %c0_26] : memref<2x128xf32, #tpu.memory_space<vmem>>, vector<1x128xf32>
    %54 = vector.broadcast %53 : vector<1x128xf32> to vector<16x128xf32>
    %55 = arith.mulf %52, %54 : vector<16x128xf32>
    %c0_27 = arith.constant 0 : index
    %c0_28 = arith.constant 0 : index
    %56 = vector.load %arg6[%c0_27, %c0_28] : memref<2x128xf32, #tpu.memory_space<vmem>>, vector<1x128xf32>
    %57 = vector.broadcast %56 : vector<1x128xf32> to vector<16x128xf32>
    %58 = arith.addf %55, %57 : vector<16x128xf32>
    %c1_i32_29 = arith.constant 1 : i32
    %59 = tpu.dynamic_rotate %58 by %c1_i32_29 dim 0 : vector<16x128xf32>, i32 -> vector<16x128xf32>
    %cst_30 = arith.constant 0.000000e+00 : f32
    %60 = vector.shape_cast %3 : vector<16x1xi1> to vector<16x1xi1>
    %61 = vector.broadcast %60 : vector<16x1xi1> to vector<16x128xi1>
    %62 = vector.broadcast %cst_30 : f32 to vector<16x128xf32>
    %63 = arith.select %61, %59, %62 : vector<16x128xi1>, vector<16x128xf32>
    %64 = arith.truncf %63 : vector<16x128xf32> to vector<16x128xbf16>
    %c15_i32_31 = arith.constant 15 : i32
    %65 = tpu.dynamic_rotate %58 by %c15_i32_31 dim 0 : vector<16x128xf32>, i32 -> vector<16x128xf32>
    %cst_32 = arith.constant 0.000000e+00 : f32
    %66 = vector.shape_cast %5 : vector<16x1xi1> to vector<16x1xi1>
    %67 = vector.broadcast %66 : vector<16x1xi1> to vector<16x128xi1>
    %68 = vector.broadcast %cst_32 : f32 to vector<16x128xf32>
    %69 = arith.select %67, %65, %68 : vector<16x128xi1>, vector<16x128xf32>
    %70 = arith.truncf %69 : vector<16x128xf32> to vector<16x128xbf16>
    %71 = arith.truncf %58 : vector<16x128xf32> to vector<16x128xbf16>
    %c1_33 = arith.constant 1 : index
    %c0_34 = arith.constant 0 : index
    %c0_35 = arith.constant 0 : index
    %c0_36 = arith.constant 0 : index
    %72 = vector.load %arg3[%c1_33, %c0_34, %c0_35, %c0_36] : memref<2x3x128x128xbf16, #tpu.memory_space<vmem>>, vector<1x1x128x128xbf16>
    %73 = vector.shape_cast %72 : vector<1x1x128x128xbf16> to vector<128x128xbf16>
    %cst_37 = arith.constant dense<0.000000e+00> : vector<16x128xf32>
    %74 = tpu.matmul %64, %73, %cst_37 {dimension_numbers = #tpu.dot_dimension_numbers<[1], [0], [0], [1], [0, 0, 1, 1], [], []>} : vector<16x128xbf16>, vector<128x128xbf16>, vector<16x128xf32> -> vector<16x128xf32>
    %c1_38 = arith.constant 1 : index
    %c1_39 = arith.constant 1 : index
    %c0_40 = arith.constant 0 : index
    %c0_41 = arith.constant 0 : index
    %75 = vector.load %arg3[%c1_38, %c1_39, %c0_40, %c0_41] : memref<2x3x128x128xbf16, #tpu.memory_space<vmem>>, vector<1x1x128x128xbf16>
    %76 = vector.shape_cast %75 : vector<1x1x128x128xbf16> to vector<128x128xbf16>
    %cst_42 = arith.constant dense<0.000000e+00> : vector<16x128xf32>
    %77 = tpu.matmul %71, %76, %cst_42 {dimension_numbers = #tpu.dot_dimension_numbers<[1], [0], [0], [1], [0, 0, 1, 1], [], []>} : vector<16x128xbf16>, vector<128x128xbf16>, vector<16x128xf32> -> vector<16x128xf32>
    %78 = arith.addf %74, %77 : vector<16x128xf32>
    %c1_43 = arith.constant 1 : index
    %c2_44 = arith.constant 2 : index
    %c0_45 = arith.constant 0 : index
    %c0_46 = arith.constant 0 : index
    %79 = vector.load %arg3[%c1_43, %c2_44, %c0_45, %c0_46] : memref<2x3x128x128xbf16, #tpu.memory_space<vmem>>, vector<1x1x128x128xbf16>
    %80 = vector.shape_cast %79 : vector<1x1x128x128xbf16> to vector<128x128xbf16>
    %cst_47 = arith.constant dense<0.000000e+00> : vector<16x128xf32>
    %81 = tpu.matmul %70, %80, %cst_47 {dimension_numbers = #tpu.dot_dimension_numbers<[1], [0], [0], [1], [0, 0, 1, 1], [], []>} : vector<16x128xbf16>, vector<128x128xbf16>, vector<16x128xf32> -> vector<16x128xf32>
    %82 = arith.addf %78, %81 : vector<16x128xf32>
    %c1_48 = arith.constant 1 : index
    %c0_49 = arith.constant 0 : index
    %83 = vector.load %arg4[%c1_48, %c0_49] : memref<2x128xf32, #tpu.memory_space<vmem>>, vector<1x128xf32>
    %84 = vector.broadcast %83 : vector<1x128xf32> to vector<16x128xf32>
    %85 = arith.addf %82, %84 : vector<16x128xf32>
    %cst_50 = arith.constant 0.000000e+00 : f32
    %86 = vector.broadcast %cst_50 : f32 to vector<16x128xf32>
    %87 = arith.maximumf %85, %86 : vector<16x128xf32>
    %cst_51 = arith.constant dense<0.000000e+00> : vector<16xf32>
    %88 = vector.multi_reduction <add>, %87, %cst_51 [1] : vector<16x128xf32> to vector<16xf32>
    %89 = vector.shape_cast %88 : vector<16xf32> to vector<16x1xf32>
    %cst_52 = arith.constant 1.280000e+02 : f32
    %90 = vector.broadcast %cst_52 : f32 to vector<16x1xf32>
    %91 = arith.divf %89, %90 : vector<16x1xf32>
    %92 = arith.mulf %87, %87 : vector<16x128xf32>
    %cst_53 = arith.constant dense<0.000000e+00> : vector<16xf32>
    %93 = vector.multi_reduction <add>, %92, %cst_53 [1] : vector<16x128xf32> to vector<16xf32>
    %94 = vector.shape_cast %93 : vector<16xf32> to vector<16x1xf32>
    %cst_54 = arith.constant 1.280000e+02 : f32
    %95 = vector.broadcast %cst_54 : f32 to vector<16x1xf32>
    %96 = arith.divf %94, %95 : vector<16x1xf32>
    %97 = arith.mulf %91, %91 : vector<16x1xf32>
    %98 = arith.subf %96, %97 : vector<16x1xf32>
    %99 = vector.broadcast %91 : vector<16x1xf32> to vector<16x128xf32>
    %100 = arith.subf %87, %99 : vector<16x128xf32>
    %cst_55 = arith.constant 9.99999974E-6 : f32
    %101 = vector.broadcast %cst_55 : f32 to vector<16x1xf32>
    %102 = arith.addf %98, %101 : vector<16x1xf32>
    %103 = math.rsqrt %102 : vector<16x1xf32>
    %104 = vector.broadcast %103 : vector<16x1xf32> to vector<16x128xf32>
    %105 = arith.mulf %100, %104 : vector<16x128xf32>
    %c1_56 = arith.constant 1 : index
    %c0_57 = arith.constant 0 : index
    %106 = vector.load %arg5[%c1_56, %c0_57] : memref<2x128xf32, #tpu.memory_space<vmem>>, vector<1x128xf32>
    %107 = vector.broadcast %106 : vector<1x128xf32> to vector<16x128xf32>
    %108 = arith.mulf %105, %107 : vector<16x128xf32>
    %c1_58 = arith.constant 1 : index
    %c0_59 = arith.constant 0 : index
    %109 = vector.load %arg6[%c1_58, %c0_59] : memref<2x128xf32, #tpu.memory_space<vmem>>, vector<1x128xf32>
    %110 = vector.broadcast %109 : vector<1x128xf32> to vector<16x128xf32>
    %111 = arith.addf %108, %110 : vector<16x128xf32>
    %112 = arith.truncf %111 : vector<16x128xf32> to vector<16x128xbf16>
    %c0_60 = arith.constant 0 : index
    %c0_61 = arith.constant 0 : index
    %113 = vector.load %arg7[%c0_60, %c0_61] : memref<128x128xbf16, #tpu.memory_space<vmem>>, vector<128x128xbf16>
    %cst_62 = arith.constant dense<0.000000e+00> : vector<16x128xf32>
    %114 = tpu.matmul %112, %113, %cst_62 {dimension_numbers = #tpu.dot_dimension_numbers<[1], [0], [0], [1], [0, 0, 1, 1], [], []>} : vector<16x128xbf16>, vector<128x128xbf16>, vector<16x128xf32> -> vector<16x128xf32>
    %c0_63 = arith.constant 0 : index
    %c0_64 = arith.constant 0 : index
    %115 = vector.load %arg8[%c0_63, %c0_64] : memref<1x128xf32, #tpu.memory_space<vmem>>, vector<1x128xf32>
    %116 = vector.broadcast %115 : vector<1x128xf32> to vector<16x128xf32>
    %117 = arith.addf %114, %116 : vector<16x128xf32>
    %c0_65 = arith.constant 0 : index
    %c0_66 = arith.constant 0 : index
    %118 = vector.load %arg9[%c0_65, %c0_66] : memref<16x128xf32, #tpu.memory_space<vmem>>, vector<16x128xf32>
    tpu.vector_store %arg9[%c0_65, %c0_66], %117 {strides = array<i32>} : memref<16x128xf32, #tpu.memory_space<vmem>>, vector<16x128xf32>,
    return
  }
  func.func @transform_0(%arg0: i32) -> (i32, i32) {
    %c0_i32 = arith.constant 0 : i32
    %c0_i32_0 = arith.constant 0 : i32
    return %arg0, %c0_i32 : i32, i32
  }
  func.func @transform_1(%arg0: i32) -> (i32, i32) {
    %c0_i32 = arith.constant 0 : i32
    %c0_i32_0 = arith.constant 0 : i32
    %c0_i32_1 = arith.constant 0 : i32
    return %c0_i32, %c0_i32_0 : i32, i32
  }
  func.func @transform_2(%arg0: i32) -> (i32, i32, i32, i32) {
    %c0_i32 = arith.constant 0 : i32
    %c0_i32_0 = arith.constant 0 : i32
    %c0_i32_1 = arith.constant 0 : i32
    %c0_i32_2 = arith.constant 0 : i32
    %c0_i32_3 = arith.constant 0 : i32
    return %c0_i32, %c0_i32_0, %c0_i32_1, %c0_i32_2 : i32, i32, i32, i32
  }
  func.func @transform_3(%arg0: i32) -> (i32, i32) {
    %c0_i32 = arith.constant 0 : i32
    %c0_i32_0 = arith.constant 0 : i32
    %c0_i32_1 = arith.constant 0 : i32
    return %c0_i32, %c0_i32_0 : i32, i32
  }
  func.func @transform_4(%arg0: i32) -> (i32, i32) {
    %c0_i32 = arith.constant 0 : i32
    %c0_i32_0 = arith.constant 0 : i32
    %c0_i32_1 = arith.constant 0 : i32
    return %c0_i32, %c0_i32_0 : i32, i32
  }
  func.func @transform_5(%arg0: i32) -> (i32, i32) {
    %c0_i32 = arith.constant 0 : i32
    %c0_i32_0 = arith.constant 0 : i32
    %c0_i32_1 = arith.constant 0 : i32
    return %c0_i32, %c0_i32_0 : i32, i32
  }
  func.func @transform_6(%arg0: i32) -> (i32, i32) {
    %c0_i32 = arith.constant 0 : i32
    %c0_i32_0 = arith.constant 0 : i32
    %c0_i32_1 = arith.constant 0 : i32
    return %c0_i32, %c0_i32_0 : i32, i32
  }
  func.func @transform_7(%arg0: i32) -> (i32, i32) {
    %c0_i32 = arith.constant 0 : i32
    %c0_i32_0 = arith.constant 0 : i32
    %c0_i32_1 = arith.constant 0 : i32
    return %c0_i32, %c0_i32_0 : i32, i32
  }
  func.func @transform_8(%arg0: i32) -> (i32, i32) {
    %c0_i32 = arith.constant 0 : i32
    %c0_i32_0 = arith.constant 0 : i32
    return %arg0, %c0_i32 : i32, i32
  }
}

</mosaic_0001>

<bundles_post_ra>
// kernel: tpu_custom_call.1
= control target key start
LH: loop header
LB: loop body
LE: loop exit
PB: predicated region body
PF: predicated region fallthrough
CT: control target
= control target key end

     0   :  { %13 = vsyncpa [#allocation3], 0  ;;  %s1965_s0 = inlined_call_operand.hbm [shape: f32[16,128], index: 0, kind: input, shape index: {}]   ;;  %s1966_s1 = inlined_call_operand.hbm [shape: s32[16,1], index: 1, kind: input, shape index: {}]   ;;  %s1967_s2 = inlined_call_operand.hbm [shape: bf16[2,3,128,128], index: 2, kind: input, shape index: {}]   ;;  %s1968_s3 = inlined_call_operand.hbm [shape: f32[2,128], index: 3, kind: input, shape index: {}]   ;;  %s1969_s4 = inlined_call_operand.hbm [shape: f32[2,128], index: 4, kind: input, shape index: {}]   ;;  %s1970_s5 = inlined_call_operand.hbm [shape: f32[2,128], index: 5, kind: input, shape index: {}]   ;;  %s1971_s6 = inlined_call_operand.hbm [shape: bf16[128,128], index: 6, kind: input, shape index: {}]   ;;  %s1972_s7 = inlined_call_operand.hbm [shape: f32[1,128], index: 7, kind: input, shape index: {}]   ;;  %s1973_s8 = inlined_call_operand.hbm [shape: f32[16,128], index: 8, kind: output, shape index: {}]  }
   0x1   :  { %14 = vsyncpa [#allocation6], 0 }
   0x2   :  { %15 = vsyncpa [#allocation9], 0 }
   0x3   :  { %16 = vsyncpa [#allocation12], 0 }
   0x4   :  { %17 = vsyncpa [#allocation15], 0 }
   0x5   :  { %18 = vsyncpa [#allocation4], 0  ;;  %s1638_s27 = smov [#allocation5]   ;;  %s1639_s29 = smov [#allocation8]  }
   0x6   :  { %s36_s28 = sshll.u32 %s1638_s27, 4  ;;  %s61_s30 = sshll.u32 %s1639_s29, 4  ;;  %s37_s28 = int_to_ptr.vmem [resolvable:$true] %s36_s28  ;;  %s62_s30 = int_to_ptr.vmem [resolvable:$true] %s61_s30 }
   0x7   :  { %s1428_s11 = scalar_lea.hbm %s1966_s1, 256 }
   0x8   :  { %p1429_p0 = scmp.ne.s32.totalorder %s1966_s1, %s1428_s11  ;;  %p1432_p1 = scmp.lt.u32.totalorder %s1428_s11, %s1966_s1 }
   0xa   :  { %p1434_p2 = pnand %p1432_p1, %p1429_p0 }
   0xc   :  { %1437 = shalt.err (!%p1434_p2)
}
   0xd   :  { %s1438_s16 = scalar_lea.vmem %s37_s28, 256  ;;  %p1443_p4 = scmp.lt.s32.totalorder %s37_s28, %s37_s28 }
   0xe   :  { %p1439_p3 = scmp.ne.s32.totalorder %s37_s28, %s1438_s16  ;;  %p1444_p5 = scmp.lt.s32.totalorder %s1438_s16, %s1438_s16 }
  0x10   :  { %p1445_p6 = por %p1444_p5, %p1443_p4 }
  0x12   :  { %p1446_p7 = pnand %p1445_p6, %p1439_p3 }
  0x14   :  { %1449 = shalt.err (!%p1446_p7)
}
  0x15   :  { %s1640_s17 = smov 128   ;;  %s1641_s18 = smov 8  }
  0x16   :  { %42 = dma.hbm_to_vmem [thread:$0]  %s1966_s1, 256, %s37_s28, [#allocation6], %s1640_s17, %s1640_s17, %s1641_s18  }
  0x17   :  { %s1450_s23 = scalar_lea.hbm %s1968_s3, 32 }
  0x18   :  { %p1451_p8 = scmp.ne.s32.totalorder %s1968_s3, %s1450_s23  ;;  %p1454_p9 = scmp.lt.u32.totalorder %s1450_s23, %s1968_s3 }
  0x1a   :  { %p1456_p10 = pnand %p1454_p9, %p1451_p8 }
  0x1c   :  { %1459 = shalt.err (!%p1456_p10)
}
  0x1d   :  { %s1460_s29 = scalar_lea.vmem %s62_s30, 32  ;;  %p1465_p12 = scmp.lt.s32.totalorder %s62_s30, %s62_s30 }
  0x1e   :  { %p1461_p11 = scmp.ne.s32.totalorder %s62_s30, %s1460_s29  ;;  %p1466_p13 = scmp.lt.s32.totalorder %s1460_s29, %s1460_s29 }
  0x20   :  { %p1467_p0 = por %p1466_p13, %p1465_p12 }
  0x22   :  { %p1468_p1 = pnand %p1467_p0, %p1461_p11 }
  0x24   :  { %1471 = shalt.err (!%p1468_p1)
}
  0x25   :  { %64 = dma.hbm_to_vmem [thread:$0]  %s1968_s3, 32, %s62_s30, [#allocation9]  }
  0x26   :  { %s1642_s9 = smov [#allocation11]   ;;  %s1643_s11 = smov [#allocation2]  }
  0x27   :  { %s81_s10 = sshll.u32 %s1642_s9, 4  ;;  %s24_s12 = sshll.u32 %s1643_s11, 4  ;;  %s82_s10 = int_to_ptr.vmem [resolvable:$true] %s81_s10  ;;  %s1726_s12 = int_to_ptr.vmem [resolvable:$true] %s24_s12 }
  0x28   :  { %s1472_s15 = scalar_lea.hbm %s1970_s5, 32 }
  0x29   :  { %p1473_p2 = scmp.ne.s32.totalorder %s1970_s5, %s1472_s15  ;;  %p1476_p3 = scmp.lt.u32.totalorder %s1472_s15, %s1970_s5 }
  0x2b   :  { %p1478_p4 = pnand %p1476_p3, %p1473_p2 }
  0x2d   :  { %1481 = shalt.err (!%p1478_p4)
}
  0x2e   :  { %s1482_s3 = scalar_lea.vmem %s82_s10, 32  ;;  %p1487_p6 = scmp.lt.s32.totalorder %s82_s10, %s82_s10 }
  0x2f   :  { %p1483_p5 = scmp.ne.s32.totalorder %s82_s10, %s1482_s3  ;;  %p1488_p7 = scmp.lt.s32.totalorder %s1482_s3, %s1482_s3 }
  0x31   :  { %p1489_p8 = por %p1488_p7, %p1487_p6 }
  0x33   :  { %p1490_p9 = pnand %p1489_p8, %p1483_p5 }
  0x35   :  { %1493 = shalt.err (!%p1490_p9)
}
  0x36   :  { %84 = dma.hbm_to_vmem [thread:$0]  %s1970_s5, 32, %s82_s10, [#allocation12]  }
  0x37   :  { %s1494_s25 = scalar_lea.hbm %s1965_s0, 256 }
  0x38   :  { %p1495_p10 = scmp.ne.s32.totalorder %s1965_s0, %s1494_s25  ;;  %p1498_p11 = scmp.lt.u32.totalorder %s1494_s25, %s1965_s0 }
  0x3a   :  { %p1500_p12 = pnand %p1498_p11, %p1495_p10 }
  0x3c   :  { %1503 = shalt.err (!%p1500_p12)
}
  0x3d   :  { %s1504_s28 = scalar_lea.vmem %s1726_s12, 256  ;;  %p1509_p0 = scmp.lt.s32.totalorder %s1726_s12, %s1726_s12 }
  0x3e   :  { %p1505_p13 = scmp.ne.s32.totalorder %s1726_s12, %s1504_s28  ;;  %p1510_p1 = scmp.lt.s32.totalorder %s1504_s28, %s1504_s28 }
  0x40   :  { %p1511_p2 = por %p1510_p1, %p1509_p0 }
  0x42   :  { %p1512_p3 = pnand %p1511_p2, %p1505_p13 }
  0x44   :  { %1515 = shalt.err (!%p1512_p3)
}
  0x45   :  { %30 = dma.hbm_to_vmem [thread:$0]  %s1965_s0, 256, %s1726_s12, [#allocation3], %s1640_s17, %s1640_s17, %s1641_s18  }
  0x46   :  { %s1644_s10 = smov [#allocation7]   ;;  %s1516_s15 = scalar_lea.hbm %s1967_s2, 6144 }
  0x47   :  { %s48_s11 = sshll.u32 %s1644_s10, 4  ;;  %p1517_p4 = scmp.ne.s32.totalorder %s1967_s2, %s1516_s15  ;;  %s49_s11 = int_to_ptr.vmem [resolvable:$true] %s48_s11 }
  0x48   :  { %p1520_p5 = scmp.lt.u32.totalorder %s1516_s15, %s1967_s2 }
  0x4a   :  { %p1522_p6 = pnand %p1520_p5, %p1517_p4 }
  0x4c   :  { %1525 = shalt.err (!%p1522_p6)
}
  0x4d   :  { %s1526_s3 = scalar_lea.vmem %s49_s11, 6144  ;;  %p1531_p8 = scmp.lt.s32.totalorder %s49_s11, %s49_s11 }
  0x4e   :  { %p1527_p7 = scmp.ne.s32.totalorder %s49_s11, %s1526_s3  ;;  %p1532_p9 = scmp.lt.s32.totalorder %s1526_s3, %s1526_s3 }
  0x50   :  { %p1533_p10 = por %p1532_p9, %p1531_p8 }
  0x52   :  { %p1534_p11 = pnand %p1533_p10, %p1527_p7 }
  0x54   :  { %1537 = shalt.err (!%p1534_p11)
}
  0x55   :  { %s1645_s0 = smov 64   ;;  %s1646_s12 = smov 4  }
  0x56   :  { %54 = dma.hbm_to_vmem [thread:$0]  %s1967_s2, 6144, %s49_s11, [#allocation6], %s1645_s0, %s1645_s0, %s1646_s12  }
  0x57   :  { %s1647_s23 = smov [#allocation10]   ;;  %s1648_s25 = smov [#allocation13]  }
  0x58   :  { %s71_s24 = sshll.u32 %s1647_s23, 4  ;;  %s90_s26 = sshll.u32 %s1648_s25, 4  ;;  %s72_s24 = int_to_ptr.vmem [resolvable:$true] %s71_s24  ;;  %s91_s26 = int_to_ptr.vmem [resolvable:$true] %s90_s26 }
  0x59   :  { %s1538_s1 = scalar_lea.hbm %s1969_s4, 32 }
  0x5a   :  { %p1539_p12 = scmp.ne.s32.totalorder %s1969_s4, %s1538_s1  ;;  %p1542_p13 = scmp.lt.u32.totalorder %s1538_s1, %s1969_s4 }
  0x5c   :  { %p1544_p0 = pnand %p1542_p13, %p1539_p12 }
  0x5e   :  { %1547 = shalt.err (!%p1544_p0)
}
  0x5f   :  { %s1548_s2 = scalar_lea.vmem %s72_s24, 32  ;;  %p1553_p2 = scmp.lt.s32.totalorder %s72_s24, %s72_s24 }
  0x60   :  { %p1549_p1 = scmp.ne.s32.totalorder %s72_s24, %s1548_s2  ;;  %p1554_p3 = scmp.lt.s32.totalorder %s1548_s2, %s1548_s2 }
  0x62   :  { %p1555_p4 = por %p1554_p3, %p1553_p2 }
  0x64   :  { %p1556_p5 = pnand %p1555_p4, %p1549_p1 }
  0x66   :  { %1559 = shalt.err (!%p1556_p5)
}
  0x67   :  { %74 = dma.hbm_to_vmem [thread:$0]  %s1969_s4, 32, %s72_s24, [#allocation9]  }
  0x68   :  { %s1560_s16 = scalar_lea.hbm %s1971_s6, 1024 }
  0x69   :  { %p1561_p6 = scmp.ne.s32.totalorder %s1971_s6, %s1560_s16  ;;  %p1564_p7 = scmp.lt.u32.totalorder %s1560_s16, %s1971_s6 }
  0x6b   :  { %p1566_p8 = pnand %p1564_p7, %p1561_p6 }
  0x6d   :  { %1569 = shalt.err (!%p1566_p8)
}
  0x6e   :  { %s1570_s30 = scalar_lea.vmem %s91_s26, 1024  ;;  %p1575_p10 = scmp.lt.s32.totalorder %s91_s26, %s91_s26 }
  0x6f   :  { %p1571_p9 = scmp.ne.s32.totalorder %s91_s26, %s1570_s30  ;;  %p1576_p11 = scmp.lt.s32.totalorder %s1570_s30, %s1570_s30 }
  0x71   :  { %p1577_p12 = por %p1576_p11, %p1575_p10 }
  0x73   :  { %p1578_p13 = pnand %p1577_p12, %p1571_p9 }
  0x75   :  { %1581 = shalt.err (!%p1578_p13)
}
  0x76   :  { %96 = dma.hbm_to_vmem [thread:$0]  %s1971_s6, 1024, %s91_s26, [#allocation12], %s1645_s0, %s1645_s0, %s1646_s12  }
  0x77   :  { %s1649_s23 = smov [#allocation14]   ;;  %s1582_s29 = scalar_lea.hbm %s1972_s7, 16 }
  0x78   :  { %s103_s24 = sshll.u32 %s1649_s23, 4  ;;  %p1583_p0 = scmp.ne.s32.totalorder %s1972_s7, %s1582_s29  ;;  %s104_s24 = int_to_ptr.vmem [resolvable:$true] %s103_s24 }
  0x79   :  { %p1586_p1 = scmp.lt.u32.totalorder %s1582_s29, %s1972_s7 }
  0x7b   :  { %p1588_p2 = pnand %p1586_p1, %p1583_p0 }
  0x7d   :  { %1591 = shalt.err (!%p1588_p2)
}
  0x7e   :  { %s1592_s10 = scalar_lea.vmem %s104_s24, 16  ;;  %s1596_s6 = scalar_lea.vmem %s104_s24, 32 }
  0x7f   :  { %p1593_p3 = scmp.ne.s32.totalorder %s104_s24, %s1592_s10  ;;  %p1597_p4 = scmp.lt.s32.totalorder %s104_s24, %s104_s24 }
  0x80   :  { %p1598_p5 = scmp.lt.s32.totalorder %s1596_s6, %s1592_s10 }
  0x82   :  { %p1599_p6 = por %p1598_p5, %p1597_p4 }
  0x84   :  { %p1600_p7 = pnand %p1599_p6, %p1593_p3 }
  0x86   :  { %1603 = shalt.err (!%p1600_p7)
}
  0x87   :  { %106 = dma.hbm_to_vmem [thread:$0]  %s1972_s7, 16, %s104_s24, [#allocation15]  }
  0x88   :  { %1626 = dma.done.wait [#allocation3], 256  }
  0x89   :  { %1627 = vsyncadd [#allocation3], 4294967040 }
  0x8a   :  { %1628 = dma.done.wait [#allocation6], 6400  }
  0x8b   :  { %1629 = vsyncadd [#allocation6], 4294960896 }
  0x8c   :  { %1630 = dma.done.wait [#allocation9], 64  }
  0x8d   :  { %1631 = vsyncadd [#allocation9], 4294967232 }
  0x8e   :  { %1632 = dma.done.wait [#allocation12], 1056  }
  0x8f   :  { %1633 = vsyncadd [#allocation12], 4294966240 }
  0x90   :  { %1634 = dma.done.wait [#allocation15], 16  }
  0x91   :  { %1635 = vsyncadd [#allocation15], 4294967280  ;;  %v1650_v0 = vmov 0   ;;  %v1651_v1 = vmov 0.0   ;;  %vm1652_vm0 = vmmov 0   ;;  %v134_v2 = vld [vmem:[#allocation5] sm:$0xff]  ;;  %v142_v8 = vlaneseq }
  0x92   :  { %1363 = vset.pattern.permute.xlu1 %v1650_v0  ;;  %1362 = vset.pattern.permute.xlu0 %v1650_v0  ;;  %v135_v3 = vld [vmem:[#allocation5 + $0x8] sm:$0xff]  ;;  %vm138_vm1 = vcmp.lt.s32.totalorder %v134_v2, 7  ;;  %vm136_vm2 = vcmp.gt.s32.totalorder %v134_v2, 0  ;;  %v1364_v7 = vld [vmem:[#allocation7 + $0x40] sm:$0xff]   ;;  %v1365_v10 = vld [vmem:[#allocation7 + $0x48] sm:$0xff]   ;;  %s1653_s7 = smov [#allocation16]  }
  0x93   :  { %1206 = vmatprep.subr.bf16.mxu0 %v1651_v1  ;;  %1222 = vmatprep.mubr.msk.bf16.mxu0 %vm1652_vm0, %v1651_v1  ;;  %vm139_vm3 = vcmp.lt.s32.totalorder %v135_v3, 7  ;;  %vm137_vm4 = vcmp.gt.s32.totalorder %v135_v3, 0  ;;  %v165_v4 = vsel %vm138_vm1, 1, %v1650_v0  ;;  %v147_v5 = vsel %vm136_vm2, 1, %v1650_v0  ;;  %v1366_v12 = vld [vmem:[#allocation7 + $0x50] sm:$0xff]   ;;  %v132_v13 = vld [vmem:[#allocation2] sm:$0xff] }
  0x94   :  { %1226 = vmatprep.subr.bf16.mxu1 %v1651_v1  ;;  %1242 = vmatprep.mubr.msk.bf16.mxu1 %vm1652_vm0, %v1651_v1  ;;  %v166_v6 = vsel %vm139_vm3, 1, %v1650_v0  ;;  %v148_v9 = vsel %vm137_vm4, 1, %v1650_v0  ;;  %v1821_v11 = vshrl.u32 %v142_v8, 7  ;;  %v133_v14 = vld [vmem:[#allocation2 + $0x8] sm:$0xff]  ;;  %v140_v15 = vrot.slane %v132_v13, 7  ;;  %v1372_v17 = vld [vmem:[#allocation7] sm:$0xff]  }
  0x95   :  { %168 = vperm.xlu1 %1363, %v165_v4   ;;  %150 = vperm.xlu0 %1362, %v147_v5   ;;  %v160_v16 = vrot.slane %v132_v13, 1  ;;  %v141_v18 = vrot.slane %v133_v14, 7  ;;  %v161_v19 = vrot.slane %v133_v14, 1  ;;  %v1367_v20 = vld [vmem:[#allocation7 + $0x58] sm:$0xff]   ;;  %v1374_v21 = vld [vmem:[#allocation7 + $0x8] sm:$0xff]   ;;  %v1368_v27 = vld [vmem:[#allocation7 + $0x60] sm:$0xff]   ;;  %v178_v38 = vpack.c.bf16 %v133_v14, %v132_v13 }
  0x96   :  { %1207 = vmatpush3.bf16.msra.mxu0 %v1364_v7  ;;  %vm144_vm5 = vcmp.lt.s32.totalorder %v1821_v11, 1  ;;  %vm162_vm6 = vcmp.lt.s32.totalorder %v1821_v11, 7  ;;  %1227 = vmatpush3.bf16.msra.mxu1 %v1372_v17  ;;  %v1376_v29 = vld [vmem:[#allocation7 + $0x10] sm:$0xff]   ;;  %v1369_v30 = vld [vmem:[#allocation7 + $0x68] sm:$0xff]   ;;  %v1378_v31 = vld [vmem:[#allocation7 + $0x18] sm:$0xff]   ;;  %s1052_s26 = sshll.u32 %s1653_s7, 4  ;;  %s1053_s26 = int_to_ptr.vmem [resolvable:$true] %s1052_s26 }
  0x97   :  { %1208 = vmatprep.subr.bf16.mxu0 %v1651_v1  ;;  %1228 = vmatprep.subr.bf16.mxu1 %v1651_v1  ;;  %v1830_v22 = vsel %vm144_vm5, %v140_v15, %v141_v18  ;;  %v1834_v23 = vsel %vm144_vm5, %v141_v18, %v140_v15  ;;  %v1838_v24 = vsel %vm162_vm6, %v160_v16, %v161_v19  ;;  %v1370_v32 = vld [vmem:[#allocation7 + $0x70] sm:$0xff]   ;;  %v1380_v33 = vld [vmem:[#allocation7 + $0x20] sm:$0xff]   ;;  %v1371_v34 = vld [vmem:[#allocation7 + $0x78] sm:$0xff]   ;;  %s1604_s2 = scalar_lea.vmem %s1053_s26, 256  ;;  %p1609_p9 = scmp.lt.s32.totalorder %s1053_s26, %s1053_s26 }
  0x98   :  { %v1085_v25 = vpack.c.bf16 %v1830_v22, %v1834_v23  ;;  %v1844_v26 = vsel %vm162_vm6, %v161_v19, %v160_v16  ;;  %v1382_v35 = vld [vmem:[#allocation7 + $0x28] sm:$0xff]   ;;  %v1373_v36 = vld [vmem:[#allocation7 + $0x80] sm:$0xff]   ;;  %v1384_v37 = vld [vmem:[#allocation7 + $0x30] sm:$0xff]   ;;  %p1605_p8 = scmp.ne.s32.totalorder %s1053_s26, %s1604_s2  ;;  %p1610_p10 = scmp.lt.s32.totalorder %s1604_s2, %s1604_s2 }
  0x99   :  { %171 = vperm.xlu1 %1363, %v166_v6   ;;  %153 = vperm.xlu0 %1362, %v148_v9   ;;  %v1096_v28 = vpack.c.bf16 %v1844_v26, %v1838_v24  ;;  %v1375_v39 = vld [vmem:[#allocation7 + $0x88] sm:$0xff]   ;;  %v1386_v40 = vld [vmem:[#allocation7 + $0x38] sm:$0xff]   ;;  %v1377_v41 = vld [vmem:[#allocation7 + $0x90] sm:$0xff]  }
  0x9a   :  { %1209 = vmatpush3.bf16.msra.mxu0 %v1365_v10  ;;  %1229 = vmatpush3.bf16.msra.mxu1 %v1374_v21  ;;  %v1379_v42 = vld [vmem:[#allocation7 + $0x98] sm:$0xff]   ;;  %v1381_v43 = vld [vmem:[#allocation7 + $0xa0] sm:$0xff]   ;;  %v1383_v44 = vld [vmem:[#allocation7 + $0xa8] sm:$0xff]   ;;  %p1611_p11 = por %p1610_p10, %p1609_p9 }
  0x9b   :  { %1210 = vmatprep.subr.bf16.mxu0 %v1651_v1  ;;  %1230 = vmatprep.subr.bf16.mxu1 %v1651_v1  ;;  %v1385_v45 = vld [vmem:[#allocation7 + $0xb0] sm:$0xff]   ;;  %v1387_v46 = vld [vmem:[#allocation7 + $0xb8] sm:$0xff]   ;;  %v1098_v63 = vld [vmem:[#allocation8] ss:$0 sm:$0xff] }
  0x9c   :  { %v1388_v14 = vld [vmem:[#allocation7 + $0x100] sm:$0xff]   ;;  %v1389_v15 = vld [vmem:[#allocation7 + $0x108] sm:$0xff]   ;;  %v1391_v17 = vld [vmem:[#allocation7 + $0x110] sm:$0xff]   ;;  %p1612_p12 = pnand %p1611_p11, %p1605_p8 }
  0x9d   :  { %v1390_v16 = vld [vmem:[#allocation7 + $0xc0] sm:$0xff]   ;;  %v1392_v18 = vld [vmem:[#allocation7 + $0xc8] sm:$0xff]   ;;  %v1393_v19 = vld [vmem:[#allocation7 + $0x118] sm:$0xff]  }
  0x9e   :  { %1211 = vmatpush3.bf16.msra.mxu0 %v1366_v12  ;;  %1231 = vmatpush3.bf16.msra.mxu1 %v1376_v29  ;;  %v1395_v21 = vld [vmem:[#allocation7 + $0x120] sm:$0xff]   ;;  %v1396_v22 = vld [vmem:[#allocation7 + $0xd8] sm:$0xff]   ;;  %v1397_v23 = vld [vmem:[#allocation7 + $0x128] sm:$0xff]  }
  0x9f   :  { %1212 = vmatprep.subr.bf16.mxu0 %v1651_v1  ;;  %1232 = vmatprep.subr.bf16.mxu1 %v1651_v1  ;;  %v1398_v24 = vld [vmem:[#allocation7 + $0xe0] sm:$0xff]   ;;  %v1400_v26 = vld [vmem:[#allocation7 + $0xe8] sm:$0xff]   ;;  %v1403_v29 = vld [vmem:[#allocation7 + $0xf8] sm:$0xff]  }
  0xa0   :  { %v1410_v52 = vld [vmem:[#allocation7 + $0x170] sm:$0xff]  }
  0xa2   :  { %1213 = vmatpush3.bf16.msra.mxu0 %v1367_v20  ;;  %1233 = vmatpush3.bf16.msra.mxu1 %v1378_v31  ;;  %v1394_v20 = vld [vmem:[#allocation7 + $0xd0] sm:$0xff]  }
  0xa3   :  { %1214 = vmatprep.subr.bf16.mxu0 %v1651_v1  ;;  %1234 = vmatprep.subr.bf16.mxu1 %v1651_v1 }
  0xa6   :  { %1215 = vmatpush3.bf16.msra.mxu0 %v1368_v27  ;;  %1235 = vmatpush3.bf16.msra.mxu1 %v1380_v33  ;;  %v1401_v27 = vld [vmem:[#allocation7 + $0x138] sm:$0xff]  }
  0xa7   :  { %1216 = vmatprep.subr.bf16.mxu0 %v1651_v1  ;;  %1236 = vmatprep.subr.bf16.mxu1 %v1651_v1 }
  0xaa   :  { %1217 = vmatpush3.bf16.msra.mxu0 %v1369_v30  ;;  %1237 = vmatpush3.bf16.msra.mxu1 %v1382_v35 }
  0xab   :  { %1218 = vmatprep.subr.bf16.mxu0 %v1651_v1  ;;  %1238 = vmatprep.subr.bf16.mxu1 %v1651_v1 }
  0xae   :  { %1219 = vmatpush3.bf16.msra.mxu0 %v1370_v32  ;;  %1239 = vmatpush3.bf16.msra.mxu1 %v1384_v37 }
  0xaf   :  { %1220 = vmatprep.subr.bf16.mxu0 %v1651_v1  ;;  %1240 = vmatprep.subr.bf16.mxu1 %v1651_v1 }
  0xb2   :  { %1221 = vmatpush3.bf16.msra.mxu0 %v1371_v34  ;;  %1241 = vmatpush3.bf16.msra.mxu1 %v1386_v40 }
  0xb3   :  { %1246 = vmatprep.subr.bf16.mxu0 %v1651_v1  ;;  %1266 = vmatprep.subr.bf16.mxu1 %v1651_v1 }
  0xb5   :  { %1223 = vmatmul.mubr.bf16.vlgmr.msra.gmra.mrb[0].mxu0 %v178_v38 }
  0xb6   :  { %1247 = vmatpush3.bf16.msra.mxu0 %v1373_v36  ;;  %1262 = vmatprep.mubr.msk.bf16.mxu0 %vm1652_vm0, %v1651_v1 }
  0xb7   :  { %1248 = vmatprep.subr.bf16.mxu0 %v1651_v1 }
  0xba   :  { %1249 = vmatpush3.bf16.msra.mxu0 %v1375_v39 }
  0xbb   :  { %1250 = vmatprep.subr.bf16.mxu0 %v1651_v1 }
  0xbe   :  { %1251 = vmatpush3.bf16.msra.mxu0 %v1377_v41 }
  0xbf   :  { %1252 = vmatprep.subr.bf16.mxu0 %v1651_v1 }
  0xc2   :  { %1253 = vmatpush3.bf16.msra.mxu0 %v1379_v42 }
  0xc3   :  { %1254 = vmatprep.subr.bf16.mxu0 %v1651_v1 }
  0xc6   :  { %1255 = vmatpush3.bf16.msra.mxu0 %v1381_v43 }
  0xc7   :  { %1256 = vmatprep.subr.bf16.mxu0 %v1651_v1 }
  0xca   :  { %1257 = vmatpush3.bf16.msra.mxu0 %v1383_v44 }
  0xcb   :  { %1258 = vmatprep.subr.bf16.mxu0 %v1651_v1 }
  0xce   :  { %1259 = vmatpush3.bf16.msra.mxu0 %v1385_v45 }
  0xcf   :  { %1260 = vmatprep.subr.bf16.mxu0 %v1651_v1 }
  0xd2   :  { %1261 = vmatpush3.bf16.msra.mxu0 %v1387_v46  ;;  %v1099_v46 = vld [vmem:[#allocation10] ss:$0 sm:$0xff] }
  0xd3   :  { %1286 = vmatprep.subr.bf16.mxu0 %v1651_v1 }
 0x114   :  { %v169_v47 = vpop.permute.xlu1 %168  ;;  %v151_v48 = vpop.permute.xlu0 %150 }
 0x115   :  { %vm173_vm7 = vcmp.eq.s32.totalorder %v169_v47, 1  ;;  %vm155_vm10 = vcmp.eq.s32.totalorder %v151_v48, 1 }
 0x118   :  { %v172_v49 = vpop.permute.xlu1 %171  ;;  %v154_v50 = vpop.permute.xlu0 %153 }
 0x119   :  { %vm174_vm8 = vcmp.eq.s32.totalorder %v172_v49, 1  ;;  %vm156_vm9 = vcmp.eq.s32.totalorder %v154_v50, 1 }
 0x11a   :  { %vm1870_vm11 = vmpackc.low %vm174_vm8, %vm173_vm7 }
 0x11b   :  { %vm1874_vm12 = vmpackc.low %vm156_vm9, %vm155_vm10  ;;  %1263 = vmatmul.mubr.msk.bf16.vlgmr.msra.gmra.mrb[4].mxu0 %vm1870_vm11, %v1096_v28  ;;  %v1402_v28 = vld [vmem:[#allocation7 + $0xf0] sm:$0xff]  }
 0x11c   :  { %1243 = vmatmul.mubr.msk.bf16.vlgmr.msra.gmra.mrb[0].mxu1 %vm1874_vm12, %v1085_v25  ;;  %1302 = vmatprep.mubr.msk.bf16.mxu0 %vm1652_vm0, %v1651_v1  ;;  %v1399_v25 = vld [vmem:[#allocation7 + $0x130] sm:$0xff]  }
 0x11d   :  { %1282 = vmatprep.mubr.msk.bf16.mxu1 %vm1652_vm0, %v1651_v1  ;;  %1267 = vmatpush3.bf16.msra.mxu1 %v1388_v14 }
 0x11e   :  { %1268 = vmatprep.subr.bf16.mxu1 %v1651_v1  ;;  %1287 = vmatpush3.bf16.msra.mxu0 %v1390_v16 }
 0x11f   :  { %1288 = vmatprep.subr.bf16.mxu0 %v1651_v1 }
 0x121   :  { %1269 = vmatpush3.bf16.msra.mxu1 %v1389_v15 }
 0x122   :  { %1270 = vmatprep.subr.bf16.mxu1 %v1651_v1  ;;  %1289 = vmatpush3.bf16.msra.mxu0 %v1392_v18 }
 0x123   :  { %1290 = vmatprep.subr.bf16.mxu0 %v1651_v1 }
 0x125   :  { %1271 = vmatpush3.bf16.msra.mxu1 %v1391_v17 }
 0x126   :  { %1272 = vmatprep.subr.bf16.mxu1 %v1651_v1  ;;  %1291 = vmatpush3.bf16.msra.mxu0 %v1394_v20 }
 0x127   :  { %1292 = vmatprep.subr.bf16.mxu0 %v1651_v1 }
 0x129   :  { %1273 = vmatpush3.bf16.msra.mxu1 %v1393_v19 }
 0x12a   :  { %1274 = vmatprep.subr.bf16.mxu1 %v1651_v1  ;;  %1293 = vmatpush3.bf16.msra.mxu0 %v1396_v22 }
 0x12b   :  { %1294 = vmatprep.subr.bf16.mxu0 %v1651_v1 }
 0x12d   :  { %1275 = vmatpush3.bf16.msra.mxu1 %v1395_v21 }
 0x12e   :  { %1276 = vmatprep.subr.bf16.mxu1 %v1651_v1  ;;  %1295 = vmatpush3.bf16.msra.mxu0 %v1398_v24 }
 0x12f   :  { %1296 = vmatprep.subr.bf16.mxu0 %v1651_v1 }
 0x131   :  { %1277 = vmatpush3.bf16.msra.mxu1 %v1397_v23 }
 0x132   :  { %1278 = vmatprep.subr.bf16.mxu1 %v1651_v1  ;;  %1297 = vmatpush3.bf16.msra.mxu0 %v1400_v26 }
 0x133   :  { %1298 = vmatprep.subr.bf16.mxu0 %v1651_v1 }
 0x135   :  { %1279 = vmatpush3.bf16.msra.mxu1 %v1399_v25  ;;  %v1131_v25 = vld [vmem:[#allocation8 + $0x1] ss:$0 sm:$0xff] }
 0x136   :  { %1280 = vmatprep.subr.bf16.mxu1 %v1651_v1  ;;  %1299 = vmatpush3.bf16.msra.mxu0 %v1402_v28 }
 0x137   :  { %1300 = vmatprep.subr.bf16.mxu0 %v1651_v1 }
 0x139   :  { %1281 = vmatpush3.bf16.msra.mxu1 %v1401_v27 }
 0x13a   :  { %1306 = vmatprep.subr.bf16.mxu1 %v1651_v1  ;;  %1301 = vmatpush3.bf16.msra.mxu0 %v1403_v29 }
 0x13b   :  { %1326 = vmatprep.subr.bf16.mxu0 %v1651_v1 }
 0x188   :  { %v294_v53 = vpop.f32.mrb[0].mxu0 }
 0x189   :  { %v1224_v54 = vpop.f32.mrb[1].mxu0 }
 0x18a   :  { %v297_v55 = vpop.f32.mrb[2].mxu0 }
 0x18b   :  { %v1225_v56 = vpop.f32.mrb[3].mxu0 }
 0x1ee   :  { %v489_v57 = vpop.f32.mrb[4].mxu0 }
 0x1ef   :  { %v383_v58 = vpop.f32.mrb[0].mxu1  ;;  %v1264_v59 = vpop.f32.mrb[5].mxu0 }
 0x1f0   :  { %v384_v60 = vadd.f32 %v383_v58, %v294_v53  ;;  %v1244_v61 = vpop.f32.mrb[1].mxu1  ;;  %v492_v62 = vpop.f32.mrb[6].mxu0  ;;  %v1100_v53 = vld [vmem:[#allocation11] ss:$0 sm:$0xff] }
 0x1f1   :  { %v386_v0 = vpop.f32.mrb[2].mxu1  ;;  %v1265_v2 = vpop.f32.mrb[7].mxu0  ;;  %v1404_v58 = vld [vmem:[#allocation7 + $0x140] sm:$0xff]  }
 0x1f2   :  { %v496_v3 = vadd.f32 %v489_v57, %v384_v60  ;;  %v387_v4 = vadd.f32 %v386_v0, %v297_v55  ;;  %v1245_v5 = vpop.f32.mrb[3].mxu1  ;;  %v1405_v2 = vld [vmem:[#allocation7 + $0x148] sm:$0xff]  }
 0x1f3   :  { %v1408_v5 = vld [vmem:[#allocation7 + $0x160] sm:$0xff]  }
 0x1f4   :  { %v503_v6 = vadd.f32 %v1098_v63, %v496_v3  ;;  %v497_v7 = vadd.f32 %v492_v62, %v387_v4  ;;  %v1406_v3 = vld [vmem:[#allocation7 + $0x150] sm:$0xff]   ;;  %v1407_v4 = vld [vmem:[#allocation7 + $0x158] sm:$0xff]  }
 0x1f6   :  { %v1892_v8 = vmax.f32 %v503_v6, 0.0  ;;  %v504_v9 = vadd.f32 %v1098_v63, %v497_v7  ;;  %v1409_v6 = vld [vmem:[#allocation7 + $0x168] sm:$0xff]  }
 0x1f8   :  { %v1894_v10 = vmax.f32 %v504_v9, 0.0  ;;  %507 = vadd.xlane.f32.xlu0 %v1892_v8  ;;  %v514_v12 = vmul.f32 %v1892_v8, %v1892_v8  ;;  %v1411_v9 = vld [vmem:[#allocation7 + $0x178] sm:$0xff]  }
 0x1fa   :  { %509 = vadd.xlane.f32.xlu1 %v1894_v10  ;;  %v515_v13 = vmul.f32 %v1894_v10, %v1894_v10 }
 0x1fc   :  { %516 = vadd.xlane.f32.xlu0 %v514_v12 }
 0x200   :  { %518 = vadd.xlane.f32.xlu0 %v515_v13 }
 0x285   :  { %v508_v30 = vpop.xlane.xlu0 %507 }
 0x286   :  { %v512_v31 = vmul.f32 0.0078125, %v508_v30 }
 0x287   :  { %v510_v32 = vpop.xlane.xlu1 %509 }
 0x288   :  { %v522_v34 = vmul.f32 %v512_v31, %v512_v31  ;;  %v513_v35 = vmul.f32 0.0078125, %v510_v32  ;;  %v526_v44 = vsub.f32 %v1892_v8, %v512_v31 }
 0x289   :  { %v517_v33 = vpop.xlane.xlu0 %516 }
 0x28a   :  { %v520_v36 = vmul.f32 0.0078125, %v517_v33  ;;  %v523_v39 = vmul.f32 %v513_v35, %v513_v35  ;;  %v527_v48 = vsub.f32 %v1894_v10, %v513_v35  ;;  %v1412_v35 = vld [vmem:[#allocation13] sm:$0xff]  }
 0x28c   :  { %v524_v37 = vsub.f32 %v520_v36, %v522_v34  ;;  %v1413_v36 = vld [vmem:[#allocation13 + $0x8] sm:$0xff]  }
 0x28d   :  { %v519_v38 = vpop.xlane.xlu0 %518 }
 0x28e   :  { %v528_v40 = vadd.f32 1e-05, %v524_v37  ;;  %v521_v41 = vmul.f32 0.0078125, %v519_v38  ;;  %v1414_v37 = vld [vmem:[#allocation13 + $0x10] sm:$0xff]   ;;  %v1415_v38 = vld [vmem:[#allocation13 + $0x18] sm:$0xff]  }
 0x290   :  { %1420 = vrsqrt.f32 %v528_v40  ;;  %v525_v42 = vsub.f32 %v521_v41, %v523_v39  ;;  %v1416_v39 = vld [vmem:[#allocation13 + $0x20] sm:$0xff]   ;;  %v1417_v40 = vld [vmem:[#allocation13 + $0x28] sm:$0xff]   ;;  %v1418_v41 = vld [vmem:[#allocation13 + $0x30] sm:$0xff]  }
 0x292   :  { %v529_v43 = vadd.f32 1e-05, %v525_v42  ;;  %v1419_v42 = vld [vmem:[#allocation13 + $0x38] sm:$0xff]  }
 0x294   :  { %1422 = vrsqrt.f32 %v529_v43 }
 0x29a   :  { %v1421_v45 = vpop.eup %1420 }
 0x29b   :  { %v532_v47 = vmul.f32 %v1421_v45, %v526_v44 }
 0x29d   :  { %v539_v49 = vmul.f32 %v1099_v46, %v532_v47 }
 0x29e   :  { %v1423_v50 = vpop.eup %1422 }
 0x29f   :  { %v533_v54 = vmul.f32 %v1423_v50, %v527_v48  ;;  %v546_v56 = vadd.f32 %v1100_v53, %v539_v49 }
 0x2a1   :  { %v540_v55 = vmul.f32 %v1099_v46, %v533_v54  ;;  %v548_v59 = vrot.slane %v546_v56, 7  ;;  %v555_v8 = vrot.slane %v546_v56, 1 }
 0x2a3   :  { %v547_v57 = vadd.f32 %v1100_v53, %v540_v55 }
 0x2a5   :  { %v549_v60 = vrot.slane %v547_v57, 7  ;;  %v562_v61 = vpack.c.bf16 %v547_v57, %v546_v56  ;;  %v556_v7 = vrot.slane %v547_v57, 1 }
 0x2a7   :  { %1283 = vmatmul.mubr.bf16.vlgmr.msra.gmra.mrb[4].mxu1 %v562_v61  ;;  %v550_v62 = vsel %vm144_vm5, %v548_v59, %v549_v60  ;;  %v551_v63 = vsel %vm144_vm5, %v549_v60, %v548_v59  ;;  %v557_v10 = vsel %vm162_vm6, %v555_v8, %v556_v7  ;;  %v558_v12 = vsel %vm162_vm6, %v556_v7, %v555_v8  ;;  %v1134_v7 = vld [vmem:[#allocation14] ss:$0 sm:$0xff] }
 0x2a8   :  { %1307 = vmatpush3.bf16.msra.mxu1 %v1404_v58  ;;  %v1118_v0 = vpack.c.bf16 %v550_v62, %v551_v63  ;;  %1322 = vmatprep.mubr.msk.bf16.mxu1 %vm1652_vm0, %v1651_v1  ;;  %v1129_v13 = vpack.c.bf16 %v558_v12, %v557_v10 }
 0x2a9   :  { %1308 = vmatprep.subr.bf16.mxu1 %v1651_v1 }
 0x2aa   :  { %1303 = vmatmul.mubr.msk.bf16.vlgmr.msra.gmra.mrb[8].mxu0 %vm1874_vm12, %v1118_v0 }
 0x2ab   :  { %1342 = vmatprep.mubr.msk.bf16.mxu0 %vm1652_vm0, %v1651_v1  ;;  %1327 = vmatpush3.bf16.msra.mxu0 %v1412_v35 }
 0x2ac   :  { %1309 = vmatpush3.bf16.msra.mxu1 %v1405_v2  ;;  %1328 = vmatprep.subr.bf16.mxu0 %v1651_v1 }
 0x2ad   :  { %1310 = vmatprep.subr.bf16.mxu1 %v1651_v1 }
 0x2af   :  { %1329 = vmatpush3.bf16.msra.mxu0 %v1413_v36 }
 0x2b0   :  { %1311 = vmatpush3.bf16.msra.mxu1 %v1406_v3  ;;  %1330 = vmatprep.subr.bf16.mxu0 %v1651_v1  ;;  %v1133_v3 = vld [vmem:[#allocation11 + $0x1] ss:$0 sm:$0xff] }
 0x2b1   :  { %1312 = vmatprep.subr.bf16.mxu1 %v1651_v1 }
 0x2b3   :  { %1331 = vmatpush3.bf16.msra.mxu0 %v1414_v37 }
 0x2b4   :  { %1313 = vmatpush3.bf16.msra.mxu1 %v1407_v4  ;;  %1332 = vmatprep.subr.bf16.mxu0 %v1651_v1 }
 0x2b5   :  { %1314 = vmatprep.subr.bf16.mxu1 %v1651_v1 }
 0x2b7   :  { %1333 = vmatpush3.bf16.msra.mxu0 %v1415_v38 }
 0x2b8   :  { %1315 = vmatpush3.bf16.msra.mxu1 %v1408_v5  ;;  %1334 = vmatprep.subr.bf16.mxu0 %v1651_v1 }
 0x2b9   :  { %1316 = vmatprep.subr.bf16.mxu1 %v1651_v1 }
 0x2bb   :  { %1335 = vmatpush3.bf16.msra.mxu0 %v1416_v39 }
 0x2bc   :  { %1317 = vmatpush3.bf16.msra.mxu1 %v1409_v6  ;;  %1336 = vmatprep.subr.bf16.mxu0 %v1651_v1 }
 0x2bd   :  { %1318 = vmatprep.subr.bf16.mxu1 %v1651_v1 }
 0x2bf   :  { %1337 = vmatpush3.bf16.msra.mxu0 %v1417_v40 }
 0x2c0   :  { %1319 = vmatpush3.bf16.msra.mxu1 %v1410_v52  ;;  %1338 = vmatprep.subr.bf16.mxu0 %v1651_v1 }
 0x2c1   :  { %1320 = vmatprep.subr.bf16.mxu1 %v1651_v1 }
 0x2c3   :  { %1339 = vmatpush3.bf16.msra.mxu0 %v1418_v41 }
 0x2c4   :  { %1321 = vmatpush3.bf16.msra.mxu1 %v1411_v9  ;;  %1340 = vmatprep.subr.bf16.mxu0 %v1651_v1  ;;  %v1132_v1 = vld [vmem:[#allocation10 + $0x1] ss:$0 sm:$0xff] }
 0x2c7   :  { %1323 = vmatmul.mubr.msk.bf16.vlgmr.msra.gmra.mrb[8].mxu1 %vm1870_vm11, %v1129_v13  ;;  %1341 = vmatpush3.bf16.msra.mxu0 %v1419_v42 }
 0x37a   :  { %v679_v14 = vpop.f32.mrb[4].mxu1 }
 0x37b   :  { %v1284_v15 = vpop.f32.mrb[5].mxu1 }
 0x37c   :  { %v682_v16 = vpop.f32.mrb[6].mxu1 }
 0x37d   :  { %v1285_v17 = vpop.f32.mrb[7].mxu1  ;;  %v768_v18 = vpop.f32.mrb[8].mxu0 }
 0x37e   :  { %v769_v19 = vadd.f32 %v768_v18, %v679_v14  ;;  %v1304_v20 = vpop.f32.mrb[9].mxu0 }
 0x37f   :  { %v771_v21 = vpop.f32.mrb[10].mxu0 }
 0x380   :  { %v772_v22 = vadd.f32 %v771_v21, %v682_v16  ;;  %v1305_v23 = vpop.f32.mrb[11].mxu0 }
 0x39a   :  { %v874_v24 = vpop.f32.mrb[8].mxu1 }
 0x39b   :  { %v881_v26 = vadd.f32 %v874_v24, %v769_v19  ;;  %v1324_v11 = vpop.f32.mrb[9].mxu1 }
 0x39c   :  { %v877_v27 = vpop.f32.mrb[10].mxu1 }
 0x39d   :  { %v888_v28 = vadd.f32 %v1131_v25, %v881_v26  ;;  %v882_v29 = vadd.f32 %v877_v27, %v772_v22  ;;  %v1325_v30 = vpop.f32.mrb[11].mxu1 }
 0x39f   :  { %v890_v51 = vmax.f32 %v888_v28, 0.0  ;;  %v889_v31 = vadd.f32 %v1131_v25, %v882_v29 }
 0x3a1   :  { %v891_v32 = vmax.f32 %v889_v31, 0.0  ;;  %892 = vadd.xlane.f32.xlu1 %v890_v51  ;;  %v898_v33 = vmul.f32 %v890_v51, %v890_v51 }
 0x3a3   :  { %894 = vadd.xlane.f32.xlu0 %v891_v32  ;;  %v899_v34 = vmul.f32 %v891_v32, %v891_v32 }
 0x3a5   :  { %900 = vadd.xlane.f32.xlu1 %v898_v33 }
 0x3a7   :  { %902 = vadd.xlane.f32.xlu0 %v899_v34 }
 0x42e   :  { %v893_v43 = vpop.xlane.xlu1 %892 }
 0x42f   :  { %v896_v44 = vmul.f32 0.0078125, %v893_v43 }
 0x430   :  { %v895_v45 = vpop.xlane.xlu0 %894 }
 0x431   :  { %v897_v46 = vmul.f32 0.0078125, %v895_v45  ;;  %v906_v48 = vmul.f32 %v896_v44, %v896_v44  ;;  %v910_v59 = vsub.f32 %v890_v51, %v896_v44 }
 0x432   :  { %v901_v47 = vpop.xlane.xlu1 %900 }
 0x433   :  { %v904_v49 = vmul.f32 0.0078125, %v901_v47  ;;  %v907_v53 = vmul.f32 %v897_v46, %v897_v46  ;;  %v911_v61 = vsub.f32 %v891_v32, %v897_v46 }
 0x434   :  { %v903_v50 = vpop.xlane.xlu0 %902 }
 0x435   :  { %v908_v54 = vsub.f32 %v904_v49, %v906_v48  ;;  %v905_v55 = vmul.f32 0.0078125, %v903_v50 }
 0x437   :  { %v912_v56 = vadd.f32 1e-05, %v908_v54  ;;  %v909_v57 = vsub.f32 %v905_v55, %v907_v53 }
 0x439   :  { %1424 = vrsqrt.f32 %v912_v56  ;;  %v913_v58 = vadd.f32 1e-05, %v909_v57 }
 0x43b   :  { %1426 = vrsqrt.f32 %v913_v58 }
 0x443   :  { %v1425_v60 = vpop.eup %1424 }
 0x444   :  { %v916_v62 = vmul.f32 %v1425_v60, %v910_v59 }
 0x445   :  { %v1427_v63 = vpop.eup %1426 }
 0x446   :  { %v917_v0 = vmul.f32 %v1427_v63, %v911_v61  ;;  %v923_v2 = vmul.f32 %v1132_v1, %v916_v62 }
 0x448   :  { %v924_v4 = vmul.f32 %v1132_v1, %v917_v0  ;;  %v930_v5 = vadd.f32 %v1133_v3, %v923_v2 }
 0x44a   :  { %v931_v6 = vadd.f32 %v1133_v3, %v924_v4 }
 0x44c   :  { %v932_v52 = vpack.c.bf16 %v931_v6, %v930_v5 }
 0x44e   :  { %1343 = vmatmul.mubr.bf16.vlgmr.msra.gmra.mrb[12].mxu0 %v932_v52 }
 0x521   :  { %v1038_v8 = vpop.f32.mrb[12].mxu0 }
 0x522   :  { %v1039_v9 = vadd.f32 %v1134_v7, %v1038_v8  ;;  %v1344_v10 = vpop.f32.mrb[13].mxu0 }
 0x523   :  { %v1041_v12 = vpop.f32.mrb[14].mxu0 }
 0x524   :  { %1045 = vst [vmem:[#allocation16] sm:$0xff] %v1039_v9  ;;  %v1042_v13 = vadd.f32 %v1134_v7, %v1041_v12  ;;  %v1345_v14 = vpop.f32.mrb[15].mxu0 }
 0x526   :  { %1046 = vst [vmem:[#allocation16 + $0x8] sm:$0xff] %v1042_v13 }
 0x527   :  { %1615 = shalt.err (!%p1612_p12)
}
 0x528   :  { %s1616_s14 = scalar_lea.hbm %s1973_s8, 256 }
 0x529   :  { %p1617_p13 = scmp.ne.s32.totalorder %s1973_s8, %s1616_s14  ;;  %p1620_p0 = scmp.lt.u32.totalorder %s1616_s14, %s1973_s8 }
 0x52b   :  { %p1622_p1 = pnand %p1620_p0, %p1617_p13 }
 0x52d   :  { %1625 = shalt.err (!%p1622_p1)
}
 0x52e   :  { %1058 = dma.vmem_to_hbm [thread:$0]  %s1053_s26, 256, %s1973_s8, [#allocation4], %s1640_s17, %s1640_s17, %s1641_s18  }
 0x52f   :  { %1636 = dma.done.wait [#allocation4], 256  }
 0x530   :  { %1637 = vsyncadd [#allocation4], 4294967040 }
 0x531   :  { %1062 = vsyncpa [#allocation3], 1 }
 0x532   :  { %1063 = vsyncpa [#allocation6], 1 }
 0x533   :  { %1064 = vsyncpa [#allocation9], 1 }
 0x534   :  { %1065 = vsyncpa [#allocation12], 1 }
 0x535   :  { %1066 = vsyncpa [#allocation15], 1 }
 0x536   :  { %1067 = vsyncpa [#allocation4], 1 }

</bundles_post_ra>
